<compile_context>
chip_gen: v5e
topology: v5e:2x2
jax: 0.10.0
libtpu: 0.0.40
codegen_flags: <defaults>
</compile_context>

<pallas_src>
import math

import jax
import jax.numpy as jnp
from jax.experimental import pallas as pl
from jax.experimental.pallas import tpu as pltpu


def _round_up(x, m):
    return ((x + m - 1) // m) * m


# ------------------------- parameter slab layout / packing -------------------------

def slab_layout(input_size, hidden_size, out_features, num_layers):
    """Row layout of the single packed parameter slab (all blocks 8-row aligned)."""
    H = hidden_size
    rows = 0
    layers = []
    for l in range(num_layers):
        d_in = input_size if l == 0 else H
        d_in_pad = _round_up(d_in, 8)
        off_wih = rows; rows += d_in_pad
        off_whh = rows; rows += _round_up(H, 8)
        off_b = rows; rows += 8
        layers.append(dict(off_wih=off_wih, d_in=d_in, d_in_pad=d_in_pad,
                           off_whh=off_whh, off_b=off_b))
    off_fcw = rows; rows += _round_up(H, 8)
    off_fcb = rows; rows += 8
    return dict(layers=layers, off_fcw=off_fcw, off_fcb=off_fcb,
                rows=rows, width=max(H, out_features))


def pack_params(params, input_size, hidden_size, output_size, num_layers, ahead):
    """Pack all per-layer weights/biases + FC head into one [R, W] f32 slab (one DMA)."""
    H = hidden_size
    O = output_size * ahead
    lay = slab_layout(input_size, hidden_size, O, num_layers)
    slab = jnp.zeros((lay["rows"], lay["width"]), jnp.float32)
    for l, (w_ih_t, w_hh_t, b) in enumerate(params["layers"]):
        L = lay["layers"][l]
        slab = slab.at[L["off_wih"]:L["off_wih"] + L["d_in"], :H].set(w_ih_t)
        slab = slab.at[L["off_whh"]:L["off_whh"] + H, :H].set(w_hh_t)
        slab = slab.at[L["off_b"], :H].set(b[0])
    slab = slab.at[lay["off_fcw"]:lay["off_fcw"] + H, :O].set(params["fc_w"])
    slab = slab.at[lay["off_fcb"], :O].set(params["fc_b"][0])
    return slab


# ------------------------- fused Pallas kernel -------------------------

def make_fused_rnn_kernel(num_layers, T, BB, H, O, lay):
    """num_layers stacked tanh-RNN layers + FC head on the last timestep.

    Kernel refs:
      x_ref   [T, BB, D_pad]  time-major input block (batch block BB=8, feature zero-padded)
      p_ref   [R, W]          packed parameter slab (single DMA)
      out_ref [BB, O]         FC output for this batch block
    """
    layers = lay["layers"]
    off_fcw, off_fcb = lay["off_fcw"], lay["off_fcb"]

    def kernel(x_ref, p_ref, out_ref):
        p = p_ref[...]
        x = x_ref[...]                                            # [T, BB, D_pad]

        # ---- layer 0: hoisted input projection (one batched MXU matmul, off the serial path)
        L0 = layers[0]
        w_ih0 = p[L0["off_wih"]:L0["off_wih"] + L0["d_in_pad"], :H]   # zero-padded rows harmless
        w_hh0 = p[L0["off_whh"]:L0["off_whh"] + H, :H]
        b0 = p[L0["off_b"]:L0["off_b"] + 1, :H]
        pre0 = jnp.einsum("tbd,dh->tbh", x, w_ih0,
                          preferred_element_type=jnp.float32) + b0    # [T, BB, H]

        h = jnp.zeros((BB, H), jnp.float32)   # h0 = zeros (matches torch.zeros(...))
        prev = []                             # per-timestep outputs of the current layer (vregs)
        for t in range(T):                    # static unroll; pre0[t] is a full-tile [8, H] slice
            h = jnp.tanh(pre0[t] + jnp.dot(h, w_hh0, preferred_element_type=jnp.float32))
            prev.append(h)

        # ---- layers 1..L-1: per-step input projection from the previous layer's value so the
        #      scheduler can wavefront layers (h[l][t] depends only on h[l-1][t], h[l][t-1]).
        for l in range(1, num_layers):
            L = layers[l]
            w_ih = p[L["off_wih"]:L["off_wih"] + H, :H]
            w_hh = p[L["off_whh"]:L["off_whh"] + H, :H]
            b = p[L["off_b"]:L["off_b"] + 1, :H]
            h = jnp.zeros((BB, H), jnp.float32)
            outs = []
            for t in range(T):
                h = jnp.tanh(jnp.dot(prev[t], w_ih, preferred_element_type=jnp.float32)
                             + jnp.dot(h, w_hh, preferred_element_type=jnp.float32) + b)
                outs.append(h)
            prev = outs

        # ---- FC head on the final timestep of the top layer
        fc_w = p[off_fcw:off_fcw + H, :O]
        fc_b = p[off_fcb:off_fcb + 1, :O]
        out_ref[...] = (jnp.dot(prev[-1], fc_w, preferred_element_type=jnp.float32)
                        + fc_b).astype(out_ref.dtype)

    return kernel


# ------------------------- wrapper -------------------------

def rnn_forward(x, slab, input_size, hidden_size, output_size, num_layers, ahead):
    """x: [B, T, input_size] (batch_first, like the PyTorch module)."""
    B, T, D = x.shape
    H = hidden_size
    O = output_size * ahead
    BB = 8                                    # batch block = one sublane tile
    B_pad = _round_up(max(B, BB), BB)
    D_pad = _round_up(D, 8)
    lay = slab_layout(input_size, hidden_size, O, num_layers)
    R, W = lay["rows"], lay["width"]

    # batch_first [B, T, D] -> time-major [T, B_pad, D_pad]; batch & feature zero-padded to 8.
    xt = jnp.transpose(x.astype(jnp.float32), (1, 0, 2))
    xt = jnp.pad(xt, ((0, 0), (0, B_pad - B), (0, D_pad - D)))

    out = pl.pallas_call(
        make_fused_rnn_kernel(num_layers, T, BB, H, O, lay),
        out_shape=jax.ShapeDtypeStruct((B_pad, O), jnp.float32),
        grid=(B_pad // BB,),                  # no-op at B=2; shards batch blocks on v7x (2 TCs)
        in_specs=[pl.BlockSpec((T, BB, D_pad), lambda i: (0, i, 0)),
                  pl.BlockSpec((R, W), lambda i: (0, 0))],   # params stay VMEM-resident
        out_specs=pl.BlockSpec((BB, O), lambda i: (i, 0)),
        compiler_params=pltpu.CompilerParams(dimension_semantics=("parallel",)),
    )(xt, slab)
    return out[:B].reshape(B, ahead, output_size)


# ------------------------- params (matches nn.RNN + nn.Linear shapes/init) -------------------------

def init_params(key, input_size, hidden_size, output_size, num_layers, ahead):
    params = {"layers": [], "fc_w": None, "fc_b": None}
    bound = 1.0 / math.sqrt(hidden_size)
    for l in range(num_layers):
        d_in = input_size if l == 0 else hidden_size
        key, k1, k2, k3, k4 = jax.random.split(key, 5)
        w_ih = jax.random.uniform(k1, (hidden_size, d_in), jnp.float32, -bound, bound)
        w_hh = jax.random.uniform(k2, (hidden_size, hidden_size), jnp.float32, -bound, bound)
        b_ih = jax.random.uniform(k3, (hidden_size,), jnp.float32, -bound, bound)
        b_hh = jax.random.uniform(k4, (hidden_size,), jnp.float32, -bound, bound)
        # pre-transposed weights + fused bias for the kernel
        params["layers"].append((w_ih.T, w_hh.T, (b_ih + b_hh)[None, :]))
    o = output_size * ahead
    fb = 1.0 / math.sqrt(hidden_size)
    key, k1, k2 = jax.random.split(key, 3)
    fc_w = jax.random.uniform(k1, (o, hidden_size), jnp.float32, -fb, fb)
    fc_b = jax.random.uniform(k2, (o,), jnp.float32, -fb, fb)
    params["fc_w"] = fc_w.T
    params["fc_b"] = fc_b[None, :]
    return params


# ------------------------- pure-JAX reference -------------------------

def rnn_forward_ref(x, params, num_layers, ahead, output_size):
    B, T, _ = x.shape
    seq = x.astype(jnp.float32)
    for l in range(num_layers):
        w_ih_t, w_hh_t, b = params["layers"][l]
        h = jnp.zeros((B, w_hh_t.shape[0]), jnp.float32)
        outs = []
        for t in range(T):
            h = jnp.tanh(seq[:, t, :] @ w_ih_t + h @ w_hh_t + b)
            outs.append(h)
        seq = jnp.stack(outs, axis=1)
    out = seq[:, -1, :] @ params["fc_w"] + params["fc_b"]
    return out.reshape(B, ahead, output_size)


if __name__ == "__main__":
    input_size, hidden_size, output_size, num_layers, ahead = 4, 32, 4, 2, 3
    B, T = 2, 8

    key = jax.random.PRNGKey(0)
    key, kx = jax.random.split(key)
    x = jax.random.normal(kx, (B, T, input_size), jnp.float32)

    params = init_params(key, input_size, hidden_size, output_size, num_layers, ahead)
    slab = pack_params(params, input_size, hidden_size, output_size, num_layers, ahead)

    out = rnn_forward(x, slab, input_size, hidden_size, output_size, num_layers, ahead)
    out = jax.block_until_ready(out)

    ref = rnn_forward_ref(x, params, num_layers, ahead, output_size)
    assert out.shape == (B, ahead, output_size)
    assert jnp.allclose(out, ref, rtol=1e-4, atol=1e-4), "mismatch vs pure-JAX reference"

    print("KERNEL_OK")
</pallas_src>

<mosaic_0001>
module attributes {stable_mosaic.version = 11 : i64} {
  func.func @kernel(%arg0: i32, %arg1: memref<8x8x8xf32, #tpu.memory_space<vmem>>, %arg2: memref<160x32xf32, #tpu.memory_space<vmem>>, %arg3: memref<8x12xf32, #tpu.memory_space<vmem>>) attributes {dimension_semantics = [#tpu.dimension_semantics<parallel>], iteration_bounds = array<i64: 1>, scalar_prefetch = 0 : i64, scratch_operands = 0 : i64, tpu.core_type = #tpu.core_type<tc>, window_params = [{transform_indices = @transform_0, window_bounds = array<i64: 8, 8, 8>}, {pipeline_mode = #tpu.pipeline_mode<synchronous>, transform_indices = @transform_1, window_bounds = array<i64: 160, 32>}, {transform_indices = @transform_2, window_bounds = array<i64: 8, 12>}]} {
    %c0 = arith.constant 0 : index
    %c0_0 = arith.constant 0 : index
    %0 = vector.load %arg2[%c0, %c0_0] : memref<160x32xf32, #tpu.memory_space<vmem>>, vector<160x32xf32>
    %c0_1 = arith.constant 0 : index
    %c0_2 = arith.constant 0 : index
    %c0_3 = arith.constant 0 : index
    %1 = vector.load %arg1[%c0_1, %c0_2, %c0_3] : memref<8x8x8xf32, #tpu.memory_space<vmem>>, vector<8x8x8xf32>
    %2 = vector.extract_strided_slice %0 {offsets = [0, 0], sizes = [8, 32], strides = [1, 1]} : vector<160x32xf32> to vector<8x32xf32>
    %3 = vector.extract_strided_slice %0 {offsets = [8, 0], sizes = [32, 32], strides = [1, 1]} : vector<160x32xf32> to vector<32x32xf32>
    %4 = vector.extract_strided_slice %0 {offsets = [40, 0], sizes = [1, 32], strides = [1, 1]} : vector<160x32xf32> to vector<1x32xf32>
    "tpu.trace_start"() <{level = 10 : i32, message = "tbd,dh->tbh"}> : () -> ()
    %cst = arith.constant dense<0.000000e+00> : vector<8x8x32xf32>
    %5 = tpu.matmul %1, %2, %cst {dimension_numbers = #tpu.dot_dimension_numbers<[2], [0], [0, 1], [1], [0, 0, 0, 1, 1, 1], [], []>} : vector<8x8x8xf32>, vector<8x32xf32>, vector<8x8x32xf32> -> vector<8x8x32xf32>
    "tpu.trace_stop"() : () -> ()
    %6 = vector.shape_cast %4 : vector<1x32xf32> to vector<1x1x32xf32>
    %7 = vector.broadcast %6 : vector<1x1x32xf32> to vector<8x8x32xf32>
    %8 = arith.addf %5, %7 : vector<8x8x32xf32>
    %cst_4 = arith.constant 0.000000e+00 : f32
    %9 = vector.broadcast %cst_4 : f32 to vector<8x32xf32>
    %10 = vector.extract_strided_slice %8 {offsets = [0, 0, 0], sizes = [1, 8, 32], strides = [1, 1, 1]} : vector<8x8x32xf32> to vector<1x8x32xf32>
    %11 = vector.shape_cast %10 : vector<1x8x32xf32> to vector<8x32xf32>
    %cst_5 = arith.constant dense<0.000000e+00> : vector<8x32xf32>
    %12 = tpu.matmul %9, %3, %cst_5 {dimension_numbers = #tpu.dot_dimension_numbers<[1], [0], [0], [1], [0, 0, 1, 1], [], []>} : vector<8x32xf32>, vector<32x32xf32>, vector<8x32xf32> -> vector<8x32xf32>
    %13 = arith.addf %11, %12 : vector<8x32xf32>
    %14 = math.tanh %13 : vector<8x32xf32>
    %15 = vector.extract_strided_slice %8 {offsets = [1, 0, 0], sizes = [1, 8, 32], strides = [1, 1, 1]} : vector<8x8x32xf32> to vector<1x8x32xf32>
    %16 = vector.shape_cast %15 : vector<1x8x32xf32> to vector<8x32xf32>
    %cst_6 = arith.constant dense<0.000000e+00> : vector<8x32xf32>
    %17 = tpu.matmul %14, %3, %cst_6 {dimension_numbers = #tpu.dot_dimension_numbers<[1], [0], [0], [1], [0, 0, 1, 1], [], []>} : vector<8x32xf32>, vector<32x32xf32>, vector<8x32xf32> -> vector<8x32xf32>
    %18 = arith.addf %16, %17 : vector<8x32xf32>
    %19 = math.tanh %18 : vector<8x32xf32>
    %20 = vector.extract_strided_slice %8 {offsets = [2, 0, 0], sizes = [1, 8, 32], strides = [1, 1, 1]} : vector<8x8x32xf32> to vector<1x8x32xf32>
    %21 = vector.shape_cast %20 : vector<1x8x32xf32> to vector<8x32xf32>
    %cst_7 = arith.constant dense<0.000000e+00> : vector<8x32xf32>
    %22 = tpu.matmul %19, %3, %cst_7 {dimension_numbers = #tpu.dot_dimension_numbers<[1], [0], [0], [1], [0, 0, 1, 1], [], []>} : vector<8x32xf32>, vector<32x32xf32>, vector<8x32xf32> -> vector<8x32xf32>
    %23 = arith.addf %21, %22 : vector<8x32xf32>
    %24 = math.tanh %23 : vector<8x32xf32>
    %25 = vector.extract_strided_slice %8 {offsets = [3, 0, 0], sizes = [1, 8, 32], strides = [1, 1, 1]} : vector<8x8x32xf32> to vector<1x8x32xf32>
    %26 = vector.shape_cast %25 : vector<1x8x32xf32> to vector<8x32xf32>
    %cst_8 = arith.constant dense<0.000000e+00> : vector<8x32xf32>
    %27 = tpu.matmul %24, %3, %cst_8 {dimension_numbers = #tpu.dot_dimension_numbers<[1], [0], [0], [1], [0, 0, 1, 1], [], []>} : vector<8x32xf32>, vector<32x32xf32>, vector<8x32xf32> -> vector<8x32xf32>
    %28 = arith.addf %26, %27 : vector<8x32xf32>
    %29 = math.tanh %28 : vector<8x32xf32>
    %30 = vector.extract_strided_slice %8 {offsets = [4, 0, 0], sizes = [1, 8, 32], strides = [1, 1, 1]} : vector<8x8x32xf32> to vector<1x8x32xf32>
    %31 = vector.shape_cast %30 : vector<1x8x32xf32> to vector<8x32xf32>
    %cst_9 = arith.constant dense<0.000000e+00> : vector<8x32xf32>
    %32 = tpu.matmul %29, %3, %cst_9 {dimension_numbers = #tpu.dot_dimension_numbers<[1], [0], [0], [1], [0, 0, 1, 1], [], []>} : vector<8x32xf32>, vector<32x32xf32>, vector<8x32xf32> -> vector<8x32xf32>
    %33 = arith.addf %31, %32 : vector<8x32xf32>
    %34 = math.tanh %33 : vector<8x32xf32>
    %35 = vector.extract_strided_slice %8 {offsets = [5, 0, 0], sizes = [1, 8, 32], strides = [1, 1, 1]} : vector<8x8x32xf32> to vector<1x8x32xf32>
    %36 = vector.shape_cast %35 : vector<1x8x32xf32> to vector<8x32xf32>
    %cst_10 = arith.constant dense<0.000000e+00> : vector<8x32xf32>
    %37 = tpu.matmul %34, %3, %cst_10 {dimension_numbers = #tpu.dot_dimension_numbers<[1], [0], [0], [1], [0, 0, 1, 1], [], []>} : vector<8x32xf32>, vector<32x32xf32>, vector<8x32xf32> -> vector<8x32xf32>
    %38 = arith.addf %36, %37 : vector<8x32xf32>
    %39 = math.tanh %38 : vector<8x32xf32>
    %40 = vector.extract_strided_slice %8 {offsets = [6, 0, 0], sizes = [1, 8, 32], strides = [1, 1, 1]} : vector<8x8x32xf32> to vector<1x8x32xf32>
    %41 = vector.shape_cast %40 : vector<1x8x32xf32> to vector<8x32xf32>
    %cst_11 = arith.constant dense<0.000000e+00> : vector<8x32xf32>
    %42 = tpu.matmul %39, %3, %cst_11 {dimension_numbers = #tpu.dot_dimension_numbers<[1], [0], [0], [1], [0, 0, 1, 1], [], []>} : vector<8x32xf32>, vector<32x32xf32>, vector<8x32xf32> -> vector<8x32xf32>
    %43 = arith.addf %41, %42 : vector<8x32xf32>
    %44 = math.tanh %43 : vector<8x32xf32>
    %45 = vector.extract_strided_slice %8 {offsets = [7, 0, 0], sizes = [1, 8, 32], strides = [1, 1, 1]} : vector<8x8x32xf32> to vector<1x8x32xf32>
    %46 = vector.shape_cast %45 : vector<1x8x32xf32> to vector<8x32xf32>
    %cst_12 = arith.constant dense<0.000000e+00> : vector<8x32xf32>
    %47 = tpu.matmul %44, %3, %cst_12 {dimension_numbers = #tpu.dot_dimension_numbers<[1], [0], [0], [1], [0, 0, 1, 1], [], []>} : vector<8x32xf32>, vector<32x32xf32>, vector<8x32xf32> -> vector<8x32xf32>
    %48 = arith.addf %46, %47 : vector<8x32xf32>
    %49 = math.tanh %48 : vector<8x32xf32>
    %50 = vector.extract_strided_slice %0 {offsets = [48, 0], sizes = [32, 32], strides = [1, 1]} : vector<160x32xf32> to vector<32x32xf32>
    %51 = vector.extract_strided_slice %0 {offsets = [80, 0], sizes = [32, 32], strides = [1, 1]} : vector<160x32xf32> to vector<32x32xf32>
    %52 = vector.extract_strided_slice %0 {offsets = [112, 0], sizes = [1, 32], strides = [1, 1]} : vector<160x32xf32> to vector<1x32xf32>
    %cst_13 = arith.constant 0.000000e+00 : f32
    %53 = vector.broadcast %cst_13 : f32 to vector<8x32xf32>
    %cst_14 = arith.constant dense<0.000000e+00> : vector<8x32xf32>
    %54 = tpu.matmul %14, %50, %cst_14 {dimension_numbers = #tpu.dot_dimension_numbers<[1], [0], [0], [1], [0, 0, 1, 1], [], []>} : vector<8x32xf32>, vector<32x32xf32>, vector<8x32xf32> -> vector<8x32xf32>
    %cst_15 = arith.constant dense<0.000000e+00> : vector<8x32xf32>
    %55 = tpu.matmul %53, %51, %cst_15 {dimension_numbers = #tpu.dot_dimension_numbers<[1], [0], [0], [1], [0, 0, 1, 1], [], []>} : vector<8x32xf32>, vector<32x32xf32>, vector<8x32xf32> -> vector<8x32xf32>
    %56 = arith.addf %54, %55 : vector<8x32xf32>
    %57 = vector.broadcast %52 : vector<1x32xf32> to vector<8x32xf32>
    %58 = arith.addf %56, %57 : vector<8x32xf32>
    %59 = math.tanh %58 : vector<8x32xf32>
    %cst_16 = arith.constant dense<0.000000e+00> : vector<8x32xf32>
    %60 = tpu.matmul %19, %50, %cst_16 {dimension_numbers = #tpu.dot_dimension_numbers<[1], [0], [0], [1], [0, 0, 1, 1], [], []>} : vector<8x32xf32>, vector<32x32xf32>, vector<8x32xf32> -> vector<8x32xf32>
    %cst_17 = arith.constant dense<0.000000e+00> : vector<8x32xf32>
    %61 = tpu.matmul %59, %51, %cst_17 {dimension_numbers = #tpu.dot_dimension_numbers<[1], [0], [0], [1], [0, 0, 1, 1], [], []>} : vector<8x32xf32>, vector<32x32xf32>, vector<8x32xf32> -> vector<8x32xf32>
    %62 = arith.addf %60, %61 : vector<8x32xf32>
    %63 = vector.broadcast %52 : vector<1x32xf32> to vector<8x32xf32>
    %64 = arith.addf %62, %63 : vector<8x32xf32>
    %65 = math.tanh %64 : vector<8x32xf32>
    %cst_18 = arith.constant dense<0.000000e+00> : vector<8x32xf32>
    %66 = tpu.matmul %24, %50, %cst_18 {dimension_numbers = #tpu.dot_dimension_numbers<[1], [0], [0], [1], [0, 0, 1, 1], [], []>} : vector<8x32xf32>, vector<32x32xf32>, vector<8x32xf32> -> vector<8x32xf32>
    %cst_19 = arith.constant dense<0.000000e+00> : vector<8x32xf32>
    %67 = tpu.matmul %65, %51, %cst_19 {dimension_numbers = #tpu.dot_dimension_numbers<[1], [0], [0], [1], [0, 0, 1, 1], [], []>} : vector<8x32xf32>, vector<32x32xf32>, vector<8x32xf32> -> vector<8x32xf32>
    %68 = arith.addf %66, %67 : vector<8x32xf32>
    %69 = vector.broadcast %52 : vector<1x32xf32> to vector<8x32xf32>
    %70 = arith.addf %68, %69 : vector<8x32xf32>
    %71 = math.tanh %70 : vector<8x32xf32>
    %cst_20 = arith.constant dense<0.000000e+00> : vector<8x32xf32>
    %72 = tpu.matmul %29, %50, %cst_20 {dimension_numbers = #tpu.dot_dimension_numbers<[1], [0], [0], [1], [0, 0, 1, 1], [], []>} : vector<8x32xf32>, vector<32x32xf32>, vector<8x32xf32> -> vector<8x32xf32>
    %cst_21 = arith.constant dense<0.000000e+00> : vector<8x32xf32>
    %73 = tpu.matmul %71, %51, %cst_21 {dimension_numbers = #tpu.dot_dimension_numbers<[1], [0], [0], [1], [0, 0, 1, 1], [], []>} : vector<8x32xf32>, vector<32x32xf32>, vector<8x32xf32> -> vector<8x32xf32>
    %74 = arith.addf %72, %73 : vector<8x32xf32>
    %75 = vector.broadcast %52 : vector<1x32xf32> to vector<8x32xf32>
    %76 = arith.addf %74, %75 : vector<8x32xf32>
    %77 = math.tanh %76 : vector<8x32xf32>
    %cst_22 = arith.constant dense<0.000000e+00> : vector<8x32xf32>
    %78 = tpu.matmul %34, %50, %cst_22 {dimension_numbers = #tpu.dot_dimension_numbers<[1], [0], [0], [1], [0, 0, 1, 1], [], []>} : vector<8x32xf32>, vector<32x32xf32>, vector<8x32xf32> -> vector<8x32xf32>
    %cst_23 = arith.constant dense<0.000000e+00> : vector<8x32xf32>
    %79 = tpu.matmul %77, %51, %cst_23 {dimension_numbers = #tpu.dot_dimension_numbers<[1], [0], [0], [1], [0, 0, 1, 1], [], []>} : vector<8x32xf32>, vector<32x32xf32>, vector<8x32xf32> -> vector<8x32xf32>
    %80 = arith.addf %78, %79 : vector<8x32xf32>
    %81 = vector.broadcast %52 : vector<1x32xf32> to vector<8x32xf32>
    %82 = arith.addf %80, %81 : vector<8x32xf32>
    %83 = math.tanh %82 : vector<8x32xf32>
    %cst_24 = arith.constant dense<0.000000e+00> : vector<8x32xf32>
    %84 = tpu.matmul %39, %50, %cst_24 {dimension_numbers = #tpu.dot_dimension_numbers<[1], [0], [0], [1], [0, 0, 1, 1], [], []>} : vector<8x32xf32>, vector<32x32xf32>, vector<8x32xf32> -> vector<8x32xf32>
    %cst_25 = arith.constant dense<0.000000e+00> : vector<8x32xf32>
    %85 = tpu.matmul %83, %51, %cst_25 {dimension_numbers = #tpu.dot_dimension_numbers<[1], [0], [0], [1], [0, 0, 1, 1], [], []>} : vector<8x32xf32>, vector<32x32xf32>, vector<8x32xf32> -> vector<8x32xf32>
    %86 = arith.addf %84, %85 : vector<8x32xf32>
    %87 = vector.broadcast %52 : vector<1x32xf32> to vector<8x32xf32>
    %88 = arith.addf %86, %87 : vector<8x32xf32>
    %89 = math.tanh %88 : vector<8x32xf32>
    %cst_26 = arith.constant dense<0.000000e+00> : vector<8x32xf32>
    %90 = tpu.matmul %44, %50, %cst_26 {dimension_numbers = #tpu.dot_dimension_numbers<[1], [0], [0], [1], [0, 0, 1, 1], [], []>} : vector<8x32xf32>, vector<32x32xf32>, vector<8x32xf32> -> vector<8x32xf32>
    %cst_27 = arith.constant dense<0.000000e+00> : vector<8x32xf32>
    %91 = tpu.matmul %89, %51, %cst_27 {dimension_numbers = #tpu.dot_dimension_numbers<[1], [0], [0], [1], [0, 0, 1, 1], [], []>} : vector<8x32xf32>, vector<32x32xf32>, vector<8x32xf32> -> vector<8x32xf32>
    %92 = arith.addf %90, %91 : vector<8x32xf32>
    %93 = vector.broadcast %52 : vector<1x32xf32> to vector<8x32xf32>
    %94 = arith.addf %92, %93 : vector<8x32xf32>
    %95 = math.tanh %94 : vector<8x32xf32>
    %cst_28 = arith.constant dense<0.000000e+00> : vector<8x32xf32>
    %96 = tpu.matmul %49, %50, %cst_28 {dimension_numbers = #tpu.dot_dimension_numbers<[1], [0], [0], [1], [0, 0, 1, 1], [], []>} : vector<8x32xf32>, vector<32x32xf32>, vector<8x32xf32> -> vector<8x32xf32>
    %cst_29 = arith.constant dense<0.000000e+00> : vector<8x32xf32>
    %97 = tpu.matmul %95, %51, %cst_29 {dimension_numbers = #tpu.dot_dimension_numbers<[1], [0], [0], [1], [0, 0, 1, 1], [], []>} : vector<8x32xf32>, vector<32x32xf32>, vector<8x32xf32> -> vector<8x32xf32>
    %98 = arith.addf %96, %97 : vector<8x32xf32>
    %99 = vector.broadcast %52 : vector<1x32xf32> to vector<8x32xf32>
    %100 = arith.addf %98, %99 : vector<8x32xf32>
    %101 = math.tanh %100 : vector<8x32xf32>
    %102 = vector.extract_strided_slice %0 {offsets = [120, 0], sizes = [32, 12], strides = [1, 1]} : vector<160x32xf32> to vector<32x12xf32>
    %103 = vector.extract_strided_slice %0 {offsets = [152, 0], sizes = [1, 12], strides = [1, 1]} : vector<160x32xf32> to vector<1x12xf32>
    %cst_30 = arith.constant dense<0.000000e+00> : vector<8x12xf32>
    %104 = tpu.matmul %101, %102, %cst_30 {dimension_numbers = #tpu.dot_dimension_numbers<[1], [0], [0], [1], [0, 0, 1, 1], [], []>} : vector<8x32xf32>, vector<32x12xf32>, vector<8x12xf32> -> vector<8x12xf32>
    %105 = vector.broadcast %103 : vector<1x12xf32> to vector<8x12xf32>
    %106 = arith.addf %104, %105 : vector<8x12xf32>
    %c0_31 = arith.constant 0 : index
    %c0_32 = arith.constant 0 : index
    %107 = vector.load %arg3[%c0_31, %c0_32] : memref<8x12xf32, #tpu.memory_space<vmem>>, vector<8x12xf32>
    tpu.vector_store %arg3[%c0_31, %c0_32], %106 {strides = array<i32>} : memref<8x12xf32, #tpu.memory_space<vmem>>, vector<8x12xf32>,
    return
  }
  func.func @transform_0(%arg0: i32) -> (i32, i32, i32) {
    %c0_i32 = arith.constant 0 : i32
    %c0_i32_0 = arith.constant 0 : i32
    %c0_i32_1 = arith.constant 0 : i32
    return %c0_i32, %arg0, %c0_i32_0 : i32, i32, i32
  }
  func.func @transform_1(%arg0: i32) -> (i32, i32) {
    %c0_i32 = arith.constant 0 : i32
    %c0_i32_0 = arith.constant 0 : i32
    %c0_i32_1 = arith.constant 0 : i32
    return %c0_i32, %c0_i32_0 : i32, i32
  }
  func.func @transform_2(%arg0: i32) -> (i32, i32) {
    %c0_i32 = arith.constant 0 : i32
    %c0_i32_0 = arith.constant 0 : i32
    return %arg0, %c0_i32 : i32, i32
  }
}

</mosaic_0001>

<bundles_post_ra>
// kernel: tpu_custom_call.1
= control target key start
LH: loop header
LB: loop body
LE: loop exit
PB: predicated region body
PF: predicated region fallthrough
CT: control target
= control target key end

     0   :  { %vm41_vm0 = vcmask 64512   ;;  %s1063_s0 = inlined_call_operand.vmem [shape: f32[8,8,8], index: 0, kind: input, shape index: {}]   ;;  %s1064_s1 = inlined_call_operand.vmem [shape: f32[160,32], index: 1, kind: input, shape index: {}]   ;;  %s1065_s2 = inlined_call_operand.hbm [shape: f32[8,12], index: 2, kind: output, shape index: {}]  }
   0x1   :  { %v16_v0 = vld [vmem:[%s1064_s1 + $0x20] sm:$0xff]  ;;  %v15_v1 = vld [vmem:[%s1064_s1 + $0x18] sm:$0xff]  ;;  %v14_v4 = vld [vmem:[%s1064_s1 + $0x10] sm:$0xff] }
   0x2   :  { %v12_v2 = vld [vmem:[%s1064_s1] sm:$0xff]  ;;  %123 = vmatpush.msra.mxu1 %v16_v0  ;;  %148 = vmatpush.msra.mxu2 %v16_v0 }
   0x3   :  { %81 = vmatpush.msra.mxu0 %v12_v2  ;;  %v32_v3 = vld [vmem:[%s1063_s0] sm:$0xff] }
   0x4   :  { %711 = vmatmul.msk.f32.vlgmr.msra.gmra.mxu0 %vm41_vm0, %v32_v3 }
   0x5   :  { %7 = vsyncpa [#allocation3], 0  ;;  %124 = vmatpush.msra.mxu1 %v15_v1  ;;  %173 = vmatpush.msra.mxu3 %v16_v0  ;;  %v13_v5 = vld [vmem:[%s1064_s1 + $0x8] sm:$0xff]  ;;  %v802_v6 = vmov 0.0   ;;  %vm107_vm1 = vcmask 261120   ;;  %v34_v15 = vld [vmem:[%s1063_s0 + $0x10] sm:$0xff] }
   0x6   :  { %149 = vmatpush.msra.mxu2 %v15_v1  ;;  %v33_v7 = vld [vmem:[%s1063_s0 + $0x8] sm:$0xff]  ;;  %v35_v21 = vld [vmem:[%s1063_s0 + $0x18] sm:$0xff]  ;;  %v36_v27 = vld [vmem:[%s1063_s0 + $0x20] sm:$0xff]  ;;  %s803_s8 = smov [#allocation2]   ;;  %s702_s12 = sshll.u32 %s1065_s2, 4  ;;  %vm693_vm2 = vcmask 97280   ;;  %s703_s12 = int_to_ptr.hbm [resolvable:$true] %s702_s12 }
   0x7   :  { %125 = vmatpush.msra.mxu1 %v14_v4  ;;  %174 = vmatpush.msra.mxu3 %v15_v1  ;;  %v17_v8 = vld [vmem:[%s1064_s1 + $0x28] sm:$0xff]  ;;  %v885_v34 = vld [vmem:[%s1064_s1 + $0x60] sm:$0xff]  ;;  %v895_v36 = vld [vmem:[%s1064_s1 + $0x58] sm:$0xff]  ;;  %s700_s9 = sshll.u32 %s803_s8, 4  ;;  %s701_s9 = int_to_ptr.vmem [resolvable:$true] %s700_s9 }
   0x8   :  { %150 = vmatpush.msra.mxu2 %v14_v4  ;;  %v846_v9 = vperm.slane %v17_v8, 0  ;;  %v880_v33 = vld [vmem:[%s1064_s1 + $0x68] sm:$0xff]  ;;  %v902_v37 = vld [vmem:[%s1064_s1 + $0x50] sm:$0xff]  ;;  %v918_v39 = vld [vmem:[%s1064_s1 + $0x40] sm:$0xff] }
   0x9   :  { %126 = vmatpush.msra.mxu1 %v13_v5  ;;  %175 = vmatpush.msra.mxu3 %v14_v4  ;;  %v37_v35 = vld [vmem:[%s1063_s0 + $0x28] sm:$0xff]  ;;  %v924_v40 = vld [vmem:[%s1064_s1 + $0x38] sm:$0xff]  ;;  %v930_v41 = vld [vmem:[%s1064_s1 + $0x30] sm:$0xff] }
   0xa   :  { %127 = vmatmul.f32.vlgmr.msra.gmra.mxu1 %v802_v6  ;;  %151 = vmatpush.msra.mxu2 %v13_v5  ;;  %v911_v38 = vld [vmem:[%s1064_s1 + $0x48] sm:$0xff]  ;;  %v38_v47 = vld [vmem:[%s1063_s0 + $0x30] sm:$0xff]  ;;  %v39_v53 = vld [vmem:[%s1063_s0 + $0x38] sm:$0xff] }
   0xb   :  { %176 = vmatpush.msra.mxu3 %v13_v5  ;;  %198 = vmatpush.msrb.mxu1 %v16_v0  ;;  %v26_v58 = vld [vmem:[%s1064_s1 + $0x70] sm:$0xff] }
   0xc   :  { %223 = vmatpush.msrb.mxu2 %v16_v0  ;;  %712 = vmatmul.msk.f32.gmra.mxu0 %vm41_vm0, %v33_v7  ;;  %v979_v59 = vperm.slane %v26_v58, 0 }
   0xd   :  { %248 = vmatpush.msrb.mxu3 %v16_v0  ;;  %199 = vmatpush.msrb.mxu1 %v15_v1 }
   0xe   :  { %224 = vmatpush.msrb.mxu2 %v15_v1 }
   0xf   :  { %249 = vmatpush.msrb.mxu3 %v15_v1  ;;  %200 = vmatpush.msrb.mxu1 %v14_v4 }
  0x10   :  { %225 = vmatpush.msrb.mxu2 %v14_v4 }
  0x11   :  { %250 = vmatpush.msrb.mxu3 %v14_v4  ;;  %201 = vmatpush.msrb.mxu1 %v13_v5 }
  0x12   :  { %226 = vmatpush.msrb.mxu2 %v13_v5 }
  0x13   :  { %251 = vmatpush.msrb.mxu3 %v13_v5  ;;  %273 = vmatpush.msra.mxu1 %v16_v0 }
  0x14   :  { %713 = vmatmul.msk.f32.gmra.mxu0 %vm41_vm0, %v34_v15 }
  0x15   :  { %274 = vmatpush.msra.mxu1 %v15_v1 }
  0x17   :  { %275 = vmatpush.msra.mxu1 %v14_v4 }
  0x19   :  { %276 = vmatpush.msra.mxu1 %v13_v5 }
  0x1c   :  { %714 = vmatmul.msk.f32.gmra.mxu0 %vm41_vm0, %v35_v21 }
  0x24   :  { %715 = vmatmul.msk.f32.gmra.mxu0 %vm41_vm0, %v36_v27 }
  0x2c   :  { %716 = vmatmul.msk.f32.gmra.mxu0 %vm41_vm0, %v37_v35  ;;  %v27_v35 = vld [vmem:[%s1064_s1 + $0x78] sm:$0xff] }
  0x34   :  { %717 = vmatmul.msk.f32.gmra.mxu0 %vm41_vm0, %v38_v47 }
  0x3c   :  { %718 = vmatmul.msk.f32.gmra.mxu0 %vm41_vm0, %v39_v53 }
  0x81   :  { %v83_v10 = vpop.f32.mrf.mxu0 }
  0x82   :  { %v84_v11 = vadd.f32 %v83_v10, %v846_v9 }
  0x87   :  { %v128_v12 = vpop.f32.mrf.mxu1 }
  0x88   :  { %v131_v13 = vadd.f32 %v128_v12, %v84_v11 }
  0x89   :  { %v86_v16 = vpop.f32.mrf.mxu0 }
  0x8a   :  { %744 = vtanh.f32 %v131_v13  ;;  %v87_v17 = vadd.f32 %v86_v16, %v846_v9 }
  0x90   :  { %v849_v14 = vpop.eup %744 }
  0x91   :  { %719 = vmatmul.msk.f32.vlgmr.msra.gmra.mxu2 %vm107_vm1, %v849_v14  ;;  %v89_v22 = vpop.f32.mrf.mxu0 }
  0x92   :  { %298 = vmatpush.msra.mxu2 %v16_v0  ;;  %v90_v23 = vadd.f32 %v89_v22, %v846_v9 }
  0x94   :  { %299 = vmatpush.msra.mxu2 %v15_v1 }
  0x96   :  { %300 = vmatpush.msra.mxu2 %v14_v4 }
  0x98   :  { %301 = vmatpush.msra.mxu2 %v13_v5 }
  0x99   :  { %v92_v28 = vpop.f32.mrf.mxu0 }
  0x9a   :  { %v93_v29 = vadd.f32 %v92_v28, %v846_v9 }
  0xa1   :  { %v95_v42 = vpop.f32.mrf.mxu0 }
  0xa2   :  { %v96_v43 = vadd.f32 %v95_v42, %v846_v9 }
  0xa9   :  { %v98_v48 = vpop.f32.mrf.mxu0 }
  0xaa   :  { %v99_v49 = vadd.f32 %v98_v48, %v846_v9 }
  0xb1   :  { %v101_v54 = vpop.f32.mrf.mxu0 }
  0xb2   :  { %v102_v55 = vadd.f32 %v101_v54, %v846_v9 }
  0xb9   :  { %v104_v27 = vpop.f32.mrf.mxu0 }
 0x114   :  { %v153_v18 = vpop.f32.mrf.mxu2 }
 0x115   :  { %v156_v19 = vadd.f32 %v153_v18, %v87_v17 }
 0x117   :  { %746 = vtanh.f32 %v156_v19 }
 0x11d   :  { %v747_v20 = vpop.eup %746 }
 0x11e   :  { %720 = vmatmul.msk.f32.vlgmr.msra.gmra.mxu3 %vm107_vm1, %v747_v20 }
 0x11f   :  { %320 = vmatpush.msra.mxu3 %v880_v33 }
 0x121   :  { %321 = vmatpush.msra.mxu3 %v885_v34 }
 0x123   :  { %322 = vmatpush.msra.mxu3 %v895_v36 }
 0x125   :  { %323 = vmatpush.msra.mxu3 %v902_v37 }
 0x1a1   :  { %v178_v24 = vpop.f32.mrf.mxu3 }
 0x1a2   :  { %v181_v25 = vadd.f32 %v178_v24, %v90_v23 }
 0x1a4   :  { %748 = vtanh.f32 %v181_v25 }
 0x1aa   :  { %v864_v26 = vpop.eup %748 }
 0x1ab   :  { %721 = vmatmul.msk.f32.vlgmr.msrb.gmra.mxu1 %vm107_vm1, %v864_v26 }
 0x1ac   :  { %340 = vmatpush.msrb.mxu1 %v911_v38 }
 0x1ae   :  { %341 = vmatpush.msrb.mxu1 %v918_v39 }
 0x1b0   :  { %342 = vmatpush.msrb.mxu1 %v924_v40 }
 0x1b2   :  { %343 = vmatpush.msrb.mxu1 %v930_v41 }
 0x228   :  { %v203_v30 = vpop.f32.mrf.mxu1 }
 0x229   :  { %v206_v31 = vadd.f32 %v203_v30, %v93_v29  ;;  %v105_v29 = vadd.f32 %v104_v27, %v846_v9  ;;  %v28_v9 = vld [vmem:[%s1064_s1 + $0x80] sm:$0xff] }
 0x22b   :  { %750 = vtanh.f32 %v206_v31 }
 0x231   :  { %v873_v32 = vpop.eup %750 }
 0x232   :  { %722 = vmatmul.msk.f32.vlgmr.msrb.gmra.mxu2 %vm107_vm1, %v873_v32 }
 0x233   :  { %366 = vmatpush.msrb.mxu2 %v880_v33 }
 0x235   :  { %367 = vmatpush.msrb.mxu2 %v885_v34 }
 0x237   :  { %368 = vmatpush.msrb.mxu2 %v895_v36 }
 0x239   :  { %369 = vmatpush.msrb.mxu2 %v902_v37 }
 0x2b5   :  { %v228_v44 = vpop.f32.mrf.mxu2 }
 0x2b6   :  { %v231_v45 = vadd.f32 %v228_v44, %v96_v43 }
 0x2b8   :  { %752 = vtanh.f32 %v231_v45 }
 0x2be   :  { %v934_v46 = vpop.eup %752 }
 0x2bf   :  { %723 = vmatmul.msk.f32.vlgmr.msrb.gmra.mxu3 %vm107_vm1, %v934_v46 }
 0x2c0   :  { %386 = vmatpush.msrb.mxu3 %v911_v38 }
 0x2c2   :  { %387 = vmatpush.msrb.mxu3 %v918_v39 }
 0x2c4   :  { %388 = vmatpush.msrb.mxu3 %v924_v40 }
 0x2c6   :  { %389 = vmatpush.msrb.mxu3 %v930_v41 }
 0x2c7   :  { %324 = vmatmul.f32.vlgmr.msra.gmra.mxu3 %v802_v6 }
 0x2c8   :  { %456 = vmatpush.msra.mxu3 %v880_v33 }
 0x2ca   :  { %457 = vmatpush.msra.mxu3 %v885_v34 }
 0x2cc   :  { %458 = vmatpush.msra.mxu3 %v895_v36 }
 0x2ce   :  { %459 = vmatpush.msra.mxu3 %v902_v37 }
 0x2cf   :  { %728 = vmatmul.msk.f32.vlgmr.msrb.gmra.mxu3 %vm107_vm1, %v747_v20 }
 0x2d0   :  { %521 = vmatpush.msrb.mxu3 %v911_v38 }
 0x2d2   :  { %522 = vmatpush.msrb.mxu3 %v918_v39 }
 0x2d4   :  { %523 = vmatpush.msrb.mxu3 %v924_v40 }
 0x2d6   :  { %524 = vmatpush.msrb.mxu3 %v930_v41 }
 0x342   :  { %v253_v50 = vpop.f32.mrf.mxu3 }
 0x343   :  { %v256_v51 = vadd.f32 %v253_v50, %v99_v49 }
 0x345   :  { %754 = vtanh.f32 %v256_v51 }
 0x34a   :  { %v325_v60 = vpop.f32.mrf.mxu3 }
 0x34b   :  { %v957_v52 = vpop.eup %754 }
 0x34c   :  { %724 = vmatmul.msk.f32.vlgmr.msra.gmra.mxu1 %vm107_vm1, %v957_v52 }
 0x34d   :  { %411 = vmatpush.msra.mxu1 %v880_v33 }
 0x34f   :  { %412 = vmatpush.msra.mxu1 %v885_v34 }
 0x351   :  { %413 = vmatpush.msra.mxu1 %v895_v36 }
 0x352   :  { %v391_v3 = vpop.f32.mrf.mxu3 }
 0x353   :  { %414 = vmatpush.msra.mxu1 %v902_v37 }
 0x354   :  { %726 = vmatmul.msk.f32.vlgmr.msrb.gmra.mxu1 %vm107_vm1, %v849_v14 }
 0x355   :  { %476 = vmatpush.msrb.mxu1 %v911_v38 }
 0x357   :  { %477 = vmatpush.msrb.mxu1 %v918_v39 }
 0x359   :  { %478 = vmatpush.msrb.mxu1 %v924_v40 }
 0x35b   :  { %479 = vmatpush.msrb.mxu1 %v930_v41 }
 0x3c9   :  { %v278_v56 = vpop.f32.mrf.mxu1 }
 0x3ca   :  { %v281_v57 = vadd.f32 %v278_v56, %v102_v55 }
 0x3cc   :  { %756 = vtanh.f32 %v281_v57 }
 0x3d1   :  { %v345_v61 = vpop.f32.mrf.mxu1 }
 0x3d2   :  { %v981_v62 = vpop.eup %756  ;;  %v346_v63 = vadd.f32 %v345_v61, %v325_v60 }
 0x3d3   :  { %725 = vmatmul.msk.f32.vlgmr.msra.gmra.mxu2 %vm107_vm1, %v981_v62 }
 0x3d4   :  { %v349_v0 = vadd.f32 %v979_v59, %v346_v63  ;;  %431 = vmatpush.msra.mxu2 %v911_v38 }
 0x3d6   :  { %758 = vtanh.f32 %v349_v0  ;;  %432 = vmatpush.msra.mxu2 %v918_v39 }
 0x3d8   :  { %433 = vmatpush.msra.mxu2 %v924_v40 }
 0x3da   :  { %434 = vmatpush.msra.mxu2 %v930_v41 }
 0x3dc   :  { %v759_v1 = vpop.eup %758 }
 0x3dd   :  { %727 = vmatmul.msk.f32.vlgmr.msrb.gmra.mxu2 %vm107_vm1, %v759_v1 }
 0x3de   :  { %501 = vmatpush.msrb.mxu2 %v880_v33 }
 0x3e0   :  { %502 = vmatpush.msrb.mxu2 %v885_v34 }
 0x3e2   :  { %503 = vmatpush.msrb.mxu2 %v895_v36 }
 0x3e4   :  { %504 = vmatpush.msrb.mxu2 %v902_v37 }
 0x3e5   :  { %730 = vmatmul.msk.f32.vlgmr.msra.gmra.mxu2 %vm107_vm1, %v864_v26 }
 0x3e6   :  { %566 = vmatpush.msra.mxu2 %v911_v38 }
 0x3e8   :  { %567 = vmatpush.msra.mxu2 %v918_v39 }
 0x3ea   :  { %568 = vmatpush.msra.mxu2 %v924_v40 }
 0x3ec   :  { %569 = vmatpush.msra.mxu2 %v930_v41 }
 0x456   :  { %v303_v2 = vpop.f32.mrf.mxu2 }
 0x457   :  { %v306_v30 = vadd.f32 %v303_v2, %v105_v29 }
 0x460   :  { %v371_v4 = vpop.f32.mrf.mxu2 }
 0x461   :  { %v392_v5 = vadd.f32 %v391_v3, %v371_v4 }
 0x463   :  { %v394_v6 = vadd.f32 %v392_v5, %v979_v59 }
 0x465   :  { %760 = vtanh.f32 %v394_v6 }
 0x468   :  { %v436_v8 = vpop.f32.mrf.mxu2 }
 0x46b   :  { %v761_v7 = vpop.eup %760 }
 0x46c   :  { %729 = vmatmul.msk.f32.vlgmr.msra.gmra.mxu1 %vm107_vm1, %v761_v7 }
 0x46d   :  { %546 = vmatpush.msra.mxu1 %v880_v33 }
 0x46f   :  { %547 = vmatpush.msra.mxu1 %v885_v34 }
 0x471   :  { %548 = vmatpush.msra.mxu1 %v895_v36 }
 0x473   :  { %549 = vmatpush.msra.mxu1 %v902_v37 }
 0x474   :  { %732 = vmatmul.msk.f32.vlgmr.msrb.gmra.mxu1 %vm107_vm1, %v873_v32 }
 0x475   :  { %611 = vmatpush.msrb.mxu1 %v911_v38 }
 0x477   :  { %612 = vmatpush.msrb.mxu1 %v918_v39 }
 0x479   :  { %613 = vmatpush.msrb.mxu1 %v924_v40 }
 0x47b   :  { %614 = vmatpush.msrb.mxu1 %v930_v41 }
 0x4e9   :  { %v416_v10 = vpop.f32.mrf.mxu1 }
 0x4ea   :  { %v437_v11 = vadd.f32 %v436_v8, %v416_v10 }
 0x4ec   :  { %v439_v12 = vadd.f32 %v437_v11, %v979_v59 }
 0x4ee   :  { %762 = vtanh.f32 %v439_v12 }
 0x4f1   :  { %v481_v14 = vpop.f32.mrf.mxu1 }
 0x4f4   :  { %v763_v13 = vpop.eup %762 }
 0x4f5   :  { %731 = vmatmul.msk.f32.vlgmr.msra.gmra.mxu3 %vm107_vm1, %v763_v13 }
 0x4f6   :  { %591 = vmatpush.msra.mxu3 %v880_v33 }
 0x4f8   :  { %592 = vmatpush.msra.mxu3 %v885_v34 }
 0x4fa   :  { %593 = vmatpush.msra.mxu3 %v895_v36 }
 0x4fc   :  { %594 = vmatpush.msra.mxu3 %v902_v37 }
 0x4fd   :  { %734 = vmatmul.msk.f32.vlgmr.msrb.gmra.mxu3 %vm107_vm1, %v934_v46  ;;  %v31_v46 = vld [vmem:[%s1064_s1 + $0x98] sm:$0xff] }
 0x4fe   :  { %659 = vmatpush.msrb.mxu3 %v911_v38  ;;  %v669_v47 = vperm.slane %v31_v46, 0 }
 0x500   :  { %660 = vmatpush.msrb.mxu3 %v918_v39 }
 0x502   :  { %661 = vmatpush.msrb.mxu3 %v924_v40 }
 0x504   :  { %662 = vmatpush.msrb.mxu3 %v930_v41 }
 0x578   :  { %v461_v15 = vpop.f32.mrf.mxu3 }
 0x579   :  { %v482_v16 = vadd.f32 %v481_v14, %v461_v15 }
 0x57b   :  { %v484_v17 = vadd.f32 %v482_v16, %v979_v59 }
 0x57d   :  { %764 = vtanh.f32 %v484_v17 }
 0x580   :  { %v526_v19 = vpop.f32.mrf.mxu3 }
 0x583   :  { %v765_v18 = vpop.eup %764 }
 0x584   :  { %733 = vmatmul.msk.f32.vlgmr.msrb.gmra.mxu2 %vm107_vm1, %v765_v18 }
 0x585   :  { %636 = vmatpush.msrb.mxu2 %v880_v33  ;;  %v30_v33 = vld [vmem:[%s1064_s1 + $0x90] sm:$0xff] }
 0x586   :  { %685 = vmatpush.msrb.mxu0 %v30_v33 }
 0x587   :  { %637 = vmatpush.msrb.mxu2 %v885_v34  ;;  %v29_v34 = vld [vmem:[%s1064_s1 + $0x88] sm:$0xff] }
 0x588   :  { %686 = vmatpush.msrb.mxu0 %v29_v34 }
 0x589   :  { %638 = vmatpush.msrb.mxu2 %v895_v36 }
 0x58a   :  { %687 = vmatpush.msrb.mxu0 %v28_v9 }
 0x58b   :  { %639 = vmatpush.msrb.mxu2 %v902_v37 }
 0x58c   :  { %736 = vmatmul.msk.f32.vlgmr.msra.gmra.mxu2 %vm107_vm1, %v957_v52  ;;  %688 = vmatpush.msrb.mxu0 %v27_v35 }
 0x607   :  { %v506_v20 = vpop.f32.mrf.mxu2 }
 0x608   :  { %v527_v21 = vadd.f32 %v526_v19, %v506_v20 }
 0x60a   :  { %v529_v22 = vadd.f32 %v527_v21, %v979_v59 }
 0x60c   :  { %766 = vtanh.f32 %v529_v22 }
 0x60f   :  { %v571_v24 = vpop.f32.mrf.mxu2 }
 0x612   :  { %v767_v23 = vpop.eup %766 }
 0x613   :  { %735 = vmatmul.msk.f32.vlgmr.msra.gmra.mxu1 %vm107_vm1, %v767_v23 }
 0x61b   :  { %738 = vmatmul.msk.f32.vlgmr.msrb.gmra.mxu1 %vm107_vm1, %v981_v62 }
 0x690   :  { %v551_v25 = vpop.f32.mrf.mxu1 }
 0x691   :  { %v572_v26 = vadd.f32 %v571_v24, %v551_v25 }
 0x693   :  { %v574_v28 = vadd.f32 %v572_v26, %v979_v59 }
 0x695   :  { %768 = vtanh.f32 %v574_v28 }
 0x696   :  { %770 = vtanh.f32 %v306_v30 }
 0x698   :  { %v616_v36 = vpop.f32.mrf.mxu1 }
 0x69b   :  { %v769_v31 = vpop.eup %768 }
 0x69c   :  { %737 = vmatmul.msk.f32.vlgmr.msra.gmra.mxu3 %vm107_vm1, %v769_v31  ;;  %v771_v32 = vpop.eup %770 }
 0x6a4   :  { %740 = vmatmul.msk.f32.vlgmr.msrb.gmra.mxu3 %vm107_vm1, %v771_v32 }
 0x71f   :  { %v596_v37 = vpop.f32.mrf.mxu3 }
 0x720   :  { %v617_v38 = vadd.f32 %v616_v36, %v596_v37 }
 0x722   :  { %v619_v39 = vadd.f32 %v617_v38, %v979_v59 }
 0x724   :  { %772 = vtanh.f32 %v619_v39 }
 0x727   :  { %v664_v41 = vpop.f32.mrf.mxu3 }
 0x72a   :  { %v773_v40 = vpop.eup %772 }
 0x72b   :  { %739 = vmatmul.msk.f32.vlgmr.msrb.gmra.mxu2 %vm107_vm1, %v773_v40 }
 0x7ae   :  { %v641_v42 = vpop.f32.mrf.mxu2 }
 0x7af   :  { %v665_v43 = vadd.f32 %v664_v41, %v641_v42 }
 0x7b1   :  { %v667_v44 = vadd.f32 %v665_v43, %v979_v59 }
 0x7b3   :  { %774 = vtanh.f32 %v667_v44 }
 0x7b9   :  { %v775_v45 = vpop.eup %774 }
 0x7ba   :  { %741 = vmatmul.msk.f32.vlgmr.msrb.gmra.mxu0 %vm107_vm1, %v775_v45 }
 0x837   :  { %v690_v48 = vpop.f32.mrf.mxu0 }
 0x838   :  { %v691_v49 = vadd.f32 %v690_v48, %v669_v47 }
 0x83a   :  { %694 = vst.msk [vmem:[#allocation2] sm:$0xff] %vm693_vm2, %v691_v49 }
 0x83b   :  { %705 = dma.vmem_to_hbm [thread:$0]  %s701_s9, 128, %s703_s12, [#allocation3]  }
 0x83c   :  { %800 = dma.done.wait [#allocation3], 128  }
 0x83d   :  { %801 = vsyncadd [#allocation3], 4294967168 }
 0x83e   :  { %710 = vsyncpa [#allocation3], 1 }

</bundles_post_ra>
